<compile_context>
chip_gen: v6e
topology: v6e:2x2x1
jax: 0.10.0
libtpu: 0.0.40
codegen_flags: <defaults>
</compile_context>

<pallas_src>
import jax
import jax.numpy as jnp
from jax.experimental import pallas as pl
from jax.experimental.pallas import tpu as pltpu


def _make_conv1x1_kernel(n_inputs):
    """Kernel operating on `n_inputs` same-shaped tiles per grid step."""

    def kernel(w_ref, b_ref, *refs):
        x_refs = refs[:n_inputs]
        o_refs = refs[n_inputs:]
        w = w_ref[...].astype(jnp.float32)     # (1, C, 1) -> broadcasts over tile
        b = b_ref[0, 0]                        # scalar bias from SMEM
        for x_ref, o_ref in zip(x_refs, o_refs):
            x = x_ref[...].astype(jnp.float32)              # (tn, C, thw)
            acc = jnp.sum(x * w, axis=1, keepdims=True)     # channel reduce (sublanes)
            o_ref[...] = acc + b

    return kernel


def _pick_tiles(N, C, HW, max_block_elems):
    """Choose (tile_n, tile_hw, n_n, n_hw) given a per-input element budget."""
    # HW tiling: full dim if it fits, else a large multiple of 128 (lane-dense).
    max_tile_hw = max(128, ((max_block_elems // C) // 128) * 128)
    tile_hw = HW if HW <= max_tile_hw else max_tile_hw
    n_hw = pl.cdiv(HW, tile_hw)

    # Batch several N rows per block when HW tiles are small (amortize the
    # ~0.35us per-grid-step overhead), but keep >= 2 grid steps overall so the
    # two v7x TensorCores both get work.
    tile_n = max(1, min(N, max_block_elems // (C * tile_hw)))
    if n_hw == 1 and N > 1:
        tile_n = min(tile_n, pl.cdiv(N, 2))
    n_n = pl.cdiv(N, tile_n)

    # If everything collapsed into one block, split HW so the grid has >= 2 steps.
    if n_n * n_hw == 1 and HW >= 256:
        tile_hw = ((pl.cdiv(HW, 2) + 127) // 128) * 128
        n_hw = pl.cdiv(HW, tile_hw)
    return tile_n, tile_hw, n_n, n_hw


def conv1x1_pallas_multi(xs, weight, bias, *, max_block_elems=512 * 1024):
    """xs: list of same-shaped (N, C, H, W) arrays; weight: (C,); bias: scalar.

    Returns a tuple of (N, 1, H, W) float32 arrays (one per input)."""
    n_in = len(xs)
    N, C, H, W = xs[0].shape
    HW = H * W
    xs3 = [x.reshape(N, C, HW) for x in xs]    # free reshapes

    tile_n, tile_hw, n_n, n_hw = _pick_tiles(N, C, HW, max_block_elems)

    w3 = weight.astype(jnp.float32).reshape(1, C, 1)
    b2 = jnp.asarray(bias, jnp.float32).reshape(1, 1)

    x_spec = pl.BlockSpec((tile_n, C, tile_hw), lambda i, j: (i, 0, j))
    o_spec = pl.BlockSpec((tile_n, 1, tile_hw), lambda i, j: (i, 0, j))

    outs = pl.pallas_call(
        _make_conv1x1_kernel(n_in),
        out_shape=tuple(
            jax.ShapeDtypeStruct((N, 1, HW), jnp.float32) for _ in range(n_in)
        ),
        grid_spec=pltpu.PrefetchScalarGridSpec(
            num_scalar_prefetch=0,
            grid=(n_n, n_hw),
            in_specs=[
                pl.BlockSpec((1, C, 1), lambda i, j: (0, 0, 0)),        # weight (VMEM)
                pl.BlockSpec(memory_space=pltpu.MemorySpace.SMEM),      # bias scalar
            ] + [x_spec] * n_in,                                        # input tiles
            out_specs=tuple(o_spec for _ in range(n_in)),
        ),
        compiler_params=pltpu.CompilerParams(
            dimension_semantics=("parallel", "parallel"),
            vmem_limit_bytes=48 * 1024 * 1024,
        ),
    )(w3, b2, *xs3)

    return tuple(o.reshape(N, 1, H, W) for o in outs)   # free reshapes back


def my_model_forward(x_tuple, weight, bias):
    """x_tuple: tuple of 3 NCHW arrays, each (N, 16, H, W).
    Returns tuple of 3 arrays, each (N, 1, H, W) — matches the PyTorch module."""
    shapes = {tuple(x.shape) for x in x_tuple}
    if len(shapes) == 1:
        # Common case: identical shapes -> one fused pallas_call for all three.
        return conv1x1_pallas_multi(list(x_tuple), weight, bias)
    # Fallback: different shapes -> one call per tensor (same kernel).
    return tuple(conv1x1_pallas_multi([x], weight, bias)[0] for x in x_tuple)


if __name__ == "__main__":
    key = jax.random.PRNGKey(0)
    k_w, k_b, k0, k1, k2 = jax.random.split(key, 5)

    N, C, H, W = 2, 16, 16, 16
    # Deterministic "Conv2d(16, 1, kernel_size=1)" parameters
    # (weight of shape (out=1, in=16, 1, 1) squeezed to (16,)).
    weight = jax.random.normal(k_w, (C,), jnp.float32) * 0.1
    bias = jax.random.normal(k_b, (), jnp.float32) * 0.1

    x0 = jax.random.normal(k0, (N, C, H, W), jnp.float32)
    x1 = jax.random.normal(k1, (N, C, H, W), jnp.float32)
    x2 = jax.random.normal(k2, (N, C, H, W), jnp.float32)

    out1, out2, out3 = my_model_forward((x0, x1, x2), weight, bias)
    jax.block_until_ready((out1, out2, out3))

    # Pure-JAX reference (1x1 conv == einsum over channels + bias).
    def ref(x):
        return jnp.einsum('nchw,c->nhw', x, weight)[:, None, :, :] + bias

    assert out1.shape == (N, 1, H, W)
    assert out2.shape == (N, 1, H, W)
    assert out3.shape == (N, 1, H, W)
    assert jnp.allclose(out1, ref(x0), atol=1e-4)
    assert jnp.allclose(out2, ref(x1), atol=1e-4)
    assert jnp.allclose(out3, ref(x2), atol=1e-4)

    print("KERNEL_OK")
</pallas_src>

<mosaic_0001>
module attributes {stable_mosaic.version = 11 : i64} {
  func.func @kernel(%arg0: i32, %arg1: i32, %arg2: memref<1x16x1xf32, #tpu.memory_space<vmem>>, %arg3: memref<1x1xf32, #tpu.memory_space<smem>>, %arg4: memref<1x16x256xf32, #tpu.memory_space<vmem>>, %arg5: memref<1x16x256xf32, #tpu.memory_space<vmem>>, %arg6: memref<1x16x256xf32, #tpu.memory_space<vmem>>, %arg7: memref<1x1x256xf32, #tpu.memory_space<vmem>>, %arg8: memref<1x1x256xf32, #tpu.memory_space<vmem>>, %arg9: memref<1x1x256xf32, #tpu.memory_space<vmem>>) attributes {dimension_semantics = [#tpu.dimension_semantics<parallel>, #tpu.dimension_semantics<parallel>], iteration_bounds = array<i64: 2, 1>, scalar_prefetch = 0 : i64, scratch_operands = 0 : i64, tpu.core_type = #tpu.core_type<tc>, window_params = [{pipeline_mode = #tpu.pipeline_mode<synchronous>, transform_indices = @transform_0, window_bounds = array<i64: 1, 16, 1>}, {transform_indices = @transform_1, window_bounds = array<i64: 1, 1>}, {transform_indices = @transform_2, window_bounds = array<i64: 1, 16, 256>}, {transform_indices = @transform_3, window_bounds = array<i64: 1, 16, 256>}, {transform_indices = @transform_4, window_bounds = array<i64: 1, 16, 256>}, {transform_indices = @transform_5, window_bounds = array<i64: 1, 1, 256>}, {transform_indices = @transform_6, window_bounds = array<i64: 1, 1, 256>}, {transform_indices = @transform_7, window_bounds = array<i64: 1, 1, 256>}]} {
    %c0 = arith.constant 0 : index
    %c0_0 = arith.constant 0 : index
    %c0_1 = arith.constant 0 : index
    %0 = vector.load %arg2[%c0, %c0_0, %c0_1] : memref<1x16x1xf32, #tpu.memory_space<vmem>>, vector<1x16x1xf32>
    %c0_2 = arith.constant 0 : index
    %c0_3 = arith.constant 0 : index
    %1 = memref.load %arg3[%c0_2, %c0_3] : memref<1x1xf32, #tpu.memory_space<smem>>
    %c0_4 = arith.constant 0 : index
    %c0_5 = arith.constant 0 : index
    %c0_6 = arith.constant 0 : index
    %2 = vector.load %arg4[%c0_4, %c0_5, %c0_6] : memref<1x16x256xf32, #tpu.memory_space<vmem>>, vector<1x16x256xf32>
    %3 = vector.broadcast %0 : vector<1x16x1xf32> to vector<1x16x256xf32>
    %4 = arith.mulf %2, %3 : vector<1x16x256xf32>
    %cst = arith.constant dense<0.000000e+00> : vector<1x256xf32>
    %5 = vector.multi_reduction <add>, %4, %cst [1] : vector<1x16x256xf32> to vector<1x256xf32>
    %6 = vector.shape_cast %5 : vector<1x256xf32> to vector<1x1x256xf32>
    %7 = vector.broadcast %1 : f32 to vector<1x1x256xf32>
    %8 = arith.addf %6, %7 : vector<1x1x256xf32>
    %c0_7 = arith.constant 0 : index
    %c0_8 = arith.constant 0 : index
    %c0_9 = arith.constant 0 : index
    %9 = vector.load %arg7[%c0_7, %c0_8, %c0_9] : memref<1x1x256xf32, #tpu.memory_space<vmem>>, vector<1x1x256xf32>
    tpu.vector_store %arg7[%c0_7, %c0_8, %c0_9], %8 {strides = array<i32>} : memref<1x1x256xf32, #tpu.memory_space<vmem>>, vector<1x1x256xf32>,
    %c0_10 = arith.constant 0 : index
    %c0_11 = arith.constant 0 : index
    %c0_12 = arith.constant 0 : index
    %10 = vector.load %arg5[%c0_10, %c0_11, %c0_12] : memref<1x16x256xf32, #tpu.memory_space<vmem>>, vector<1x16x256xf32>
    %11 = vector.broadcast %0 : vector<1x16x1xf32> to vector<1x16x256xf32>
    %12 = arith.mulf %10, %11 : vector<1x16x256xf32>
    %cst_13 = arith.constant dense<0.000000e+00> : vector<1x256xf32>
    %13 = vector.multi_reduction <add>, %12, %cst_13 [1] : vector<1x16x256xf32> to vector<1x256xf32>
    %14 = vector.shape_cast %13 : vector<1x256xf32> to vector<1x1x256xf32>
    %15 = vector.broadcast %1 : f32 to vector<1x1x256xf32>
    %16 = arith.addf %14, %15 : vector<1x1x256xf32>
    %c0_14 = arith.constant 0 : index
    %c0_15 = arith.constant 0 : index
    %c0_16 = arith.constant 0 : index
    %17 = vector.load %arg8[%c0_14, %c0_15, %c0_16] : memref<1x1x256xf32, #tpu.memory_space<vmem>>, vector<1x1x256xf32>
    tpu.vector_store %arg8[%c0_14, %c0_15, %c0_16], %16 {strides = array<i32>} : memref<1x1x256xf32, #tpu.memory_space<vmem>>, vector<1x1x256xf32>,
    %c0_17 = arith.constant 0 : index
    %c0_18 = arith.constant 0 : index
    %c0_19 = arith.constant 0 : index
    %18 = vector.load %arg6[%c0_17, %c0_18, %c0_19] : memref<1x16x256xf32, #tpu.memory_space<vmem>>, vector<1x16x256xf32>
    %19 = vector.broadcast %0 : vector<1x16x1xf32> to vector<1x16x256xf32>
    %20 = arith.mulf %18, %19 : vector<1x16x256xf32>
    %cst_20 = arith.constant dense<0.000000e+00> : vector<1x256xf32>
    %21 = vector.multi_reduction <add>, %20, %cst_20 [1] : vector<1x16x256xf32> to vector<1x256xf32>
    %22 = vector.shape_cast %21 : vector<1x256xf32> to vector<1x1x256xf32>
    %23 = vector.broadcast %1 : f32 to vector<1x1x256xf32>
    %24 = arith.addf %22, %23 : vector<1x1x256xf32>
    %c0_21 = arith.constant 0 : index
    %c0_22 = arith.constant 0 : index
    %c0_23 = arith.constant 0 : index
    %25 = vector.load %arg9[%c0_21, %c0_22, %c0_23] : memref<1x1x256xf32, #tpu.memory_space<vmem>>, vector<1x1x256xf32>
    tpu.vector_store %arg9[%c0_21, %c0_22, %c0_23], %24 {strides = array<i32>} : memref<1x1x256xf32, #tpu.memory_space<vmem>>, vector<1x1x256xf32>,
    return
  }
  func.func @transform_0(%arg0: i32, %arg1: i32) -> (i32, i32, i32) {
    %c0_i32 = arith.constant 0 : i32
    %c0_i32_0 = arith.constant 0 : i32
    %c0_i32_1 = arith.constant 0 : i32
    %c0_i32_2 = arith.constant 0 : i32
    return %c0_i32, %c0_i32_0, %c0_i32_1 : i32, i32, i32
  }
  func.func @transform_1(%arg0: i32, %arg1: i32) -> (i32, i32) {
    %c0_i32 = arith.constant 0 : i32
    %c0_i32_0 = arith.constant 0 : i32
    %c0_i32_1 = arith.constant 0 : i32
    return %c0_i32, %c0_i32_0 : i32, i32
  }
  func.func @transform_2(%arg0: i32, %arg1: i32) -> (i32, i32, i32) {
    %c0_i32 = arith.constant 0 : i32
    %c0_i32_0 = arith.constant 0 : i32
    return %arg0, %c0_i32, %arg1 : i32, i32, i32
  }
  func.func @transform_3(%arg0: i32, %arg1: i32) -> (i32, i32, i32) {
    %c0_i32 = arith.constant 0 : i32
    %c0_i32_0 = arith.constant 0 : i32
    return %arg0, %c0_i32, %arg1 : i32, i32, i32
  }
  func.func @transform_4(%arg0: i32, %arg1: i32) -> (i32, i32, i32) {
    %c0_i32 = arith.constant 0 : i32
    %c0_i32_0 = arith.constant 0 : i32
    return %arg0, %c0_i32, %arg1 : i32, i32, i32
  }
  func.func @transform_5(%arg0: i32, %arg1: i32) -> (i32, i32, i32) {
    %c0_i32 = arith.constant 0 : i32
    %c0_i32_0 = arith.constant 0 : i32
    return %arg0, %c0_i32, %arg1 : i32, i32, i32
  }
  func.func @transform_6(%arg0: i32, %arg1: i32) -> (i32, i32, i32) {
    %c0_i32 = arith.constant 0 : i32
    %c0_i32_0 = arith.constant 0 : i32
    return %arg0, %c0_i32, %arg1 : i32, i32, i32
  }
  func.func @transform_7(%arg0: i32, %arg1: i32) -> (i32, i32, i32) {
    %c0_i32 = arith.constant 0 : i32
    %c0_i32_0 = arith.constant 0 : i32
    return %arg0, %c0_i32, %arg1 : i32, i32, i32
  }
}

</mosaic_0001>

<bundles_post_ra>
// kernel: tpu_custom_call.1
= control target key start
LH: loop header
LB: loop body
LE: loop exit
PB: predicated region body
PF: predicated region fallthrough
CT: control target
= control target key end

     0   :  { %s1543_s0 = inlined_call_operand.vmem [shape: f32[1,16,1], index: 0, kind: input, shape index: {}]   ;;  %s1544_s1 = inlined_call_operand.<no memory space> [shape: f32[1,1], index: 1, kind: input, shape index: {}]   ;;  %s1545_s2 = inlined_call_operand.hbm [shape: f32[2,16,256], index: 2, kind: input, shape index: {}]   ;;  %s1546_s3 = inlined_call_operand.hbm [shape: f32[2,16,256], index: 3, kind: input, shape index: {}]   ;;  %s1547_s4 = inlined_call_operand.hbm [shape: f32[2,16,256], index: 4, kind: input, shape index: {}]   ;;  %s1548_s5 = inlined_call_operand.hbm [shape: f32[2,1,256], index: 5, kind: output, shape index: {0}]   ;;  %s1549_s6 = inlined_call_operand.hbm [shape: f32[2,1,256], index: 6, kind: output, shape index: {1}]   ;;  %s1550_s7 = inlined_call_operand.hbm [shape: f32[2,1,256], index: 7, kind: output, shape index: {2}]  }
   0x1   :  { %1560 = sst [smem:[#allocation22_spill]] %s1546_s3 }
   0x2   :  { %1561 = sst [smem:[#allocation23_spill]] %s1550_s7 }
   0x3   :  { %13 = sst [smem:[#allocation2]] %s1544_s1 }
   0x4   :  { %14 = vsyncpa [#allocation4], 0 }
   0x5   :  { %16 = vsyncpa [#allocation4 + $0x1], 0 }
   0x6   :  { %17 = vsyncpa [#allocation7], 0 }
   0x7   :  { %19 = vsyncpa [#allocation7 + $0x1], 0 }
   0x8   :  { %20 = vsyncpa [#allocation5], 0 }
   0x9   :  { %22 = vsyncpa [#allocation5 + $0x1], 0 }
   0xa   :  { %23 = vsyncpa [#allocation11], 0 }
   0xb   :  { %25 = vsyncpa [#allocation11 + $0x1], 0  ;;  %s1238_s26 = smov 0   ;;  %s1240_s27 = smov 0  }
   0xc   :  { %s1242_s28 = smov 0   ;;  %s1244_s29 = smov 0  }
   0xd   :  { %s1246_s30 = smov 0   ;;  %s1248_s8 = smov 0  }
   0xe LB: > { %1562 = sst [smem:[#allocation17_spill]] %s1163_s26  ;;  %s1269_s1 = sadd.s32 4294967295, %s1183_s8   ;;  %s1183_s8 = sphi %s1248_s8, %s31_s8   ;;  %s1179_s30 = sphi %s1246_s30, %s1586_s30   ;;  %s1175_s29 = sphi %s1244_s29, %s1585_s29   ;;  %s1171_s28 = sphi %s1242_s28, %s1589_s28   ;;  %s1167_s27 = sphi %s1240_s27, %s1588_s27   ;;  %s1163_s26 = sphi %s1238_s26, %s1587_s26  }
   0xf   : > { %1563 = sst [smem:[#allocation18_spill]] %s1179_s30  ;;  %s1551_s9 = sadd.s32 4294967294, %s1183_s8  }
  0x10   : > { %s43_s10 = sadd.s32 1, %s1179_s30  ;;  %s94_s11 = sadd.s32 1, %s1171_s28 }
  0x11   : > { %p45_p0 = scmp.ge.s32.totalorder %s43_s10, 2  ;;  %p101_p1 = scmp.ne.s32.totalorder %s1171_s28, %s1167_s27 }
  0x12   : > { %p102_p2 = scmp.eq.s32.totalorder %s1183_s8, 0  ;;  %p107_p3 = scmp.ne.s32.totalorder %s1167_s27, %s1163_s26 }
  0x13   : > { %s1591_s10 = smov (%p45_p0, %s43_s10), 0  ;;  %p108_p5 = scmp.eq.s32.totalorder %s1269_s1, 0 }
  0x14   : > { %1564 = sst [smem:[#allocation19_spill]] %s1591_s10  ;;  %p1281_p4 = por %p102_p2, %p101_p1 }
  0x15   : > { %s89_s13 = ssub.s32 %s1179_s30, %s1591_s10  ;;  %p189_p6 = scmp.eq.s32.totalorder %s1269_s1, 1 }
  0x16   : > { %p92_p7 = scmp.eq.s32.totalorder %s89_s13, 0  ;;  %p1289_p8 = por %p108_p5, %p107_p3 }
  0x17   : > { %p1293_p9 = por %p189_p6, %p101_p1  ;;  %p195_p10 = scmp.eq.s32.totalorder %s1551_s9, 1 }
  0x18   : > { %s1300_s16 = scalar_select %p92_p7, %s1171_s28, %s94_s11  }
  0x19   : > { %p1302_p11 = por %p195_p10, %p107_p3  ;;  %p904_p13 = scmp.lt.s32.totalorder %s1183_s8, 2 }
  0x1a   : > { %1568 = sst [smem:[#allocation20_spill]] %s1300_s16  ;;  %s1552_s18 = sand.u32 1, %s1171_s28  }
  0x1b   : > { %s1569_s17 = scalar_select %p1302_p11, 1, 0 }
  0x1c   : > { %s1311_s19 = sshll.u32 %s1552_s18, 5  ;;  %s1314_s20 = sshll.u32 %s1179_s30, 9 }
  0x1d   : > { %1570 = sst [smem:[#allocation21_spill]] %s1569_s17  ;;  %p1318_p0 = pnand %p904_p13, %p1281_p4 }
  0x1e   : > { %s300_s22 = sand.u32 1, %s1183_s8   ;;  %s1572_s3 = sld [smem:[#allocation22_spill]] }
  0x1f   : > { %s304_s11 = scalar_lea.vmem [#allocation6], %s1311_s19  ;;  %p848_p1 = scmp.ge.s32.totalorder %s1183_s8, 1 }
  0x20   : > { %s313_s13 = sshll.u32 %s304_s11, 4  ;;  %p344_p2 = scmp.lt.s32.totalorder %s1183_s8, 3  ;;  %s314_s13 = int_to_ptr.vmem [resolvable:$true] %s313_s13 }
  0x21   : > { %s1330_s9 = scalar_lea.sflag [#allocation7], %s300_s22  ;;  %p961_p3 = pneg %p1318_p0 }
  0x22   : > { %s972_s12 = scalar_lea.vmem %s314_s13, 512  ;;  %s1185_s18 = smov [#allocation6]  }
  0x23   : > { %p973_p4 = scmp.ne.s32.totalorder %s314_s13, %s972_s12  ;;  %s977_s10 = sshll.u32 %s1185_s18, 4  ;;  %s978_s10 = int_to_ptr.vmem [resolvable:$false] %s977_s10 }
  0x24   : > { %s312_s25 = scalar_lea.hbm %s1572_s3, %s1314_s20  ;;  %s979_s23 = scalar_lea.vmem %s978_s10, 1024 }
  0x25   : > { %p975_p5 = pnand %p973_p4, %p961_p3  ;;  %p980_p7 = scmp.lt.s32.totalorder %s314_s13, %s978_s10 }
  0x26   : > { %p981_p10 = scmp.lt.s32.totalorder %s979_s23, %s972_s12 }
  0x27   : > { %p976_p6 = pneg %p975_p5 }
  0x28   : > { %p982_p13 = por %p981_p10, %p980_p7 }
  0x2a   : > { %p983_p12 = pnand %p982_p13, %p976_p6 }
  0x2c   : > { %986 = shalt.err (!%p983_p12)
}
  0x2d   : > { %s1558_s24 = smov 256   ;;  %s1187_s22 = smov 16  }
  0x2e   : > { %890 = dma.hbm_to_vmem [thread:$0]  (!%p1318_p0), %s312_s25, 512, %s314_s13, %s1330_s9, %s1558_s24, %s1558_s24, %s1187_s22  }
  0x2f   : > { %p1347_p4 = pnand %p848_p1, %p344_p2  ;;  %s289_s12 = scalar_lea.hbm %s1545_s2, %s1314_s20 }
  0x30   : > { %s281_s23 = scalar_lea.vmem [#allocation3], %s1311_s19  ;;  %s335_s17 = scalar_lea.hbm %s1547_s4, %s1314_s20 }
  0x31   : > { %s290_s3 = sshll.u32 %s281_s23, 4  ;;  %s1574_s26 = sand.u32 1, %s1171_s28   ;;  %s291_s3 = int_to_ptr.vmem [resolvable:$true] %s290_s3 }
  0x32   : > { %s278_s7 = scalar_lea.sflag [#allocation4], %s1574_s26  ;;  %s1000_s25 = scalar_lea.vmem %s291_s3, 512 }
  0x33   : > { %p1001_p12 = scmp.ne.s32.totalorder %s291_s3, %s1000_s25  ;;  %s1188_s13 = smov [#allocation3]  }
  0x34   : > { %s1005_s24 = sshll.u32 %s1188_s13, 4  ;;  %s1006_s24 = int_to_ptr.vmem [resolvable:$false] %s1005_s24 }
  0x35   : > { %p1003_p1 = pnand %p1001_p12, %p961_p3  ;;  %s1007_s18 = scalar_lea.vmem %s1006_s24, 1024 }
  0x36   : > { %p1008_p5 = scmp.lt.s32.totalorder %s291_s3, %s1006_s24  ;;  %p1009_p6 = scmp.lt.s32.totalorder %s1007_s18, %s1000_s25 }
  0x37   : > { %p1004_p2 = pneg %p1003_p1 }
  0x38   : > { %p1010_p7 = por %p1009_p6, %p1008_p5 }
  0x3a   : > { %p1011_p10 = pnand %p1010_p7, %p1004_p2 }
  0x3c   : > { %1014 = shalt.err (!%p1011_p10)
}
  0x3d   : > { %s1575_s30 = smov 256   ;;  %s327_s26 = scalar_lea.vmem [#allocation8], %s1311_s19 }
  0x3e   : > { %887 = dma.hbm_to_vmem [thread:$0]  (!%p1318_p0), %s289_s12, 512, %s291_s3, %s278_s7, %s1575_s30, %s1575_s30, %s1187_s22  }
  0x3f   : > { %s336_s16 = sshll.u32 %s327_s26, 4  ;;  %s1189_s24 = smov [#allocation8]   ;;  %s337_s16 = int_to_ptr.vmem [resolvable:$true] %s336_s16 }
  0x40   : > { %s1028_s11 = scalar_lea.vmem %s337_s16, 512  ;;  %s1033_s23 = sshll.u32 %s1189_s24, 4  ;;  %s1034_s23 = int_to_ptr.vmem [resolvable:$false] %s1033_s23 }
  0x41   : > { %p1029_p13 = scmp.ne.s32.totalorder %s337_s16, %s1028_s11  ;;  %s1035_s25 = scalar_lea.vmem %s1034_s23, 1024 }
  0x42   : > { %p1036_p2 = scmp.lt.s32.totalorder %s337_s16, %s1034_s23  ;;  %p1037_p5 = scmp.lt.s32.totalorder %s1035_s25, %s1028_s11 }
  0x43   : > { %p1031_p12 = pnand %p1029_p13, %p961_p3 }
  0x44   : > { %p1038_p6 = por %p1037_p5, %p1036_p2 }
  0x45   : > { %p1032_p1 = pneg %p1031_p12 }
  0x47   : > { %p1039_p7 = pnand %p1038_p6, %p1032_p1 }
  0x49   : > { %1042 = shalt.err (!%p1039_p7)
}
  0x4a   : > { %893 = dma.hbm_to_vmem [thread:$0]  (!%p1318_p0), %s335_s17, 512, %s337_s16, %s1330_s9, %s1575_s30, %s1575_s30, %s1187_s22  }
  0x4b   : > { %348 = sbr.rel (%p1347_p4) target bundleno = 301 (0x12d), region = 40  ;;  %s1388_s19 = sand.u32 (!%p1347_p4), 1, %s1167_s27  }
  0x4c   : > { %s849_s21 = sshll.u32 (!%p1347_p4), %s1388_s19, 5  ;;  %s351_s12 = scalar_lea.sflag (!%p1347_p4), [#allocation4], %s1388_s19 }
  0x4d   : > { %s354_s13 = scalar_lea.vmem (!%p1347_p4), [#allocation3], %s849_s21 }
  0x50   : > { %1146 = dma.done.wait (%p1289_p8), %s351_s12, 512  }
  0x51   : > { %1148 = vsyncadd (%p1289_p8), %s351_s12, 4294966784  ;;  %s359_s9 = sand.u32 1, %s1269_s1   ;;  %s363_s20 = scalar_lea.vmem [#allocation6], %s849_s21 }
  0x52   : > { %s360_s17 = scalar_lea.sflag [#allocation7], %s359_s9 }
  0x53   : > { %1150 = dma.done.wait (%p1289_p8), %s360_s17, 1024  }
  0x54   : > { %1152 = vsyncadd (%p1289_p8), %s360_s17, 4294966272  ;;  %v1190_v0 = vmov 0   ;;  %v429_v1 = vld [vmem:[%s1543_s0] sm:$0xff]  ;;  %v430_v2 = vld [vmem:[%s1543_s0 + $0x8] sm:$0xff]  ;;  %s372_s26 = scalar_lea.vmem [#allocation8], %s849_s21  ;;  %s431_s14 = sld [smem:[#allocation2]]  ;;  %v473_v49 = vlaneseq }
  0x55   : > { %958 = vset.pattern.permute.xlu0 %v1190_v0  ;;  %v432_v3 = vld [vmem:[%s354_s13] sm:$0xff]  ;;  %v433_v4 = vld [vmem:[%s354_s13 + $0x8] sm:$0xff]  ;;  %v434_v9 = vld [vmem:[%s354_s13 + $0x10] sm:$0xff]  ;;  %v1191_v47 = vmov 1966171168   ;;  %s1410_s16 = sshll.u32 %s1388_s19, 1 }
  0x56   : > { %438 = vperm.xlu0 %958, %v429_v1   ;;  %v490_v5 = vld [vmem:[%s363_s20] sm:$0xff]  ;;  %v491_v7 = vld [vmem:[%s363_s20 + $0x8] sm:$0xff]  ;;  %v435_v10 = vld [vmem:[%s354_s13 + $0x18] sm:$0xff]  ;;  %v471_v48 = vunpack.c.l.s4 %v1191_v47  ;;  %v474_v63 = vshrl.u32 %v473_v49, 7  ;;  %s869_s11 = sshll.u32 %s1175_s29, 5  ;;  %s415_s24 = scalar_lea.vmem [#allocation10], %s1410_s16 }
  0x57   : > { %v533_v8 = vld [vmem:[%s372_s26] sm:$0xff]  ;;  %v492_v11 = vld [vmem:[%s363_s20 + $0x10] sm:$0xff]  ;;  %v493_v12 = vld [vmem:[%s363_s20 + $0x18] sm:$0xff]  ;;  %s619_s23 = sshll.u32 %s415_s24, 4  ;;  %s408_s25 = scalar_lea.vmem [#allocation9], %s1410_s16  ;;  %vm1415_vm0 = vcmp.lt.s32.totalorder %v473_v49, 256  ;;  %s1427_s23 = int_to_ptr.vmem [resolvable:$true] %s619_s23 }
  0x58   : > { %v534_v13 = vld [vmem:[%s372_s26 + $0x8] sm:$0xff]  ;;  %v535_v14 = vld [vmem:[%s372_s26 + $0x10] sm:$0xff]  ;;  %v536_v15 = vld [vmem:[%s372_s26 + $0x18] sm:$0xff]  ;;  %v472_v62 = vunpack.c.0.s8 %v471_v48  ;;  %s603_s3 = sshll.u32 %s408_s25, 4  ;;  %s1422_s12 = scalar_lea.hbm %s1549_s6, %s869_s11  ;;  %s1434_s3 = int_to_ptr.vmem [resolvable:$true] %s603_s3 }
  0x59   : > { %s422_s29 = scalar_lea.vmem [#allocation12], %s1410_s16  ;;  %s1432_s22 = scalar_lea.hbm %s1548_s5, %s869_s11 }
  0x5a   : > { %443 = vperm.xlu0 %958, %v430_v2   ;;  %s635_s13 = sshll.u32 %s422_s29, 4  ;;  %s1578_s30 = sld [smem:[#allocation23_spill]]  ;;  %s1445_s13 = int_to_ptr.vmem [resolvable:$true] %s635_s13 }
  0x5b   : > { %s1449_s7 = scalar_lea.sflag [#allocation11], %s359_s9  ;;  %s1043_s21 = scalar_lea.vmem %s1427_s23, 32 }
  0x5c   : > { %p1044_p8 = scmp.ne.s32.totalorder %s1427_s23, %s1043_s21  ;;  %s1192_s17 = smov [#allocation10]  }
  0x5e   : > { %p1045_p0 = pnand %p1044_p8, %p1293_p9 }
  0x60   : > { %s1443_s26 = scalar_lea.hbm %s1578_s30, %s869_s11  ;;  %p1046_p3 = pneg %p1045_p0 }
  0xd1   : > { %v439_v6 = vpop.permute.xlu0 %438 }
  0xd2   : > { %v446_v16 = vmul.f32 %v439_v6, %v432_v3  ;;  %v447_v17 = vmul.f32 %v439_v6, %v433_v4  ;;  %v494_v18 = vmul.f32 %v490_v5, %v439_v6  ;;  %v495_v19 = vmul.f32 %v491_v7, %v439_v6 }
  0xd3   : > { %v537_v25 = vmul.f32 %v533_v8, %v439_v6  ;;  %v538_v26 = vmul.f32 %v534_v13, %v439_v6  ;;  %v464_v4 = vstv %s431_s14  ;;  %v475_v13 = vsub.s32 %v472_v62, %v474_v63  ;;  %s1579_s14 = smov %s1578_s30 }
  0xd5   : > { %v444_v20 = vpop.permute.xlu0 %443 }
  0xd6   : > { %v448_v21 = vmul.f32 %v444_v20, %v434_v9  ;;  %v449_v22 = vmul.f32 %v444_v20, %v435_v10  ;;  %v496_v23 = vmul.f32 %v492_v11, %v444_v20  ;;  %v497_v24 = vmul.f32 %v493_v12, %v444_v20 }
  0xd7   : > { %v539_v27 = vmul.f32 %v535_v14, %v444_v20  ;;  %v540_v28 = vmul.f32 %v536_v15, %v444_v20 }
  0xd8   : > { %v450_v29 = vadd.f32 %v448_v21, %v446_v16  ;;  %v457_v30 = vadd.f32 %v449_v22, %v447_v17  ;;  %v498_v31 = vadd.f32 %v496_v23, %v494_v18  ;;  %v505_v32 = vadd.f32 %v497_v24, %v495_v19 }
  0xd9   : > { %v541_v33 = vadd.f32 %v539_v27, %v537_v25  ;;  %v548_v34 = vadd.f32 %v540_v28, %v538_v26 }
  0xda   : > { %v451_v35 = vrot.slane %v450_v29, 4  ;;  %v458_v36 = vrot.slane %v457_v30, 4  ;;  %v499_v37 = vrot.slane %v498_v31, 4  ;;  %v506_v38 = vrot.slane %v505_v32, 4 }
  0xdb   : > { %v542_v39 = vrot.slane %v541_v33, 4  ;;  %v549_v40 = vrot.slane %v548_v34, 4 }
  0xdc   : > { %v452_v41 = vadd.f32 %v451_v35, %v450_v29  ;;  %v459_v42 = vadd.f32 %v458_v36, %v457_v30  ;;  %v500_v43 = vadd.f32 %v499_v37, %v498_v31  ;;  %v507_v44 = vadd.f32 %v506_v38, %v505_v32 }
  0xdd   : > { %v543_v45 = vadd.f32 %v542_v39, %v541_v33  ;;  %v550_v46 = vadd.f32 %v549_v40, %v548_v34 }
  0xde   : > { %v453_v50 = vrot.slane %v452_v41, 2  ;;  %v460_v51 = vrot.slane %v459_v42, 2  ;;  %v501_v52 = vrot.slane %v500_v43, 2  ;;  %v508_v53 = vrot.slane %v507_v44, 2 }
  0xdf   : > { %v544_v54 = vrot.slane %v543_v45, 2  ;;  %v551_v55 = vrot.slane %v550_v46, 2 }
  0xe0   : > { %v454_v56 = vadd.f32 %v453_v50, %v452_v41  ;;  %v461_v57 = vadd.f32 %v460_v51, %v459_v42  ;;  %v502_v58 = vadd.f32 %v501_v52, %v500_v43  ;;  %v509_v59 = vadd.f32 %v508_v53, %v507_v44 }
  0xe1   : > { %v545_v60 = vadd.f32 %v544_v54, %v543_v45  ;;  %v552_v61 = vadd.f32 %v551_v55, %v550_v46 }
  0xe2   : > { %v455_v0 = vrot.slane %v454_v56, 1  ;;  %v462_v1 = vrot.slane %v461_v57, 1  ;;  %v503_v2 = vrot.slane %v502_v58, 1  ;;  %v510_v3 = vrot.slane %v509_v59, 1 }
  0xe3   : > { %v546_v5 = vrot.slane %v545_v60, 1  ;;  %v553_v6 = vrot.slane %v552_v61, 1 }
  0xe4   : > { %v456_v7 = vadd.f32 %v455_v0, %v454_v56  ;;  %v463_v8 = vadd.f32 %v462_v1, %v461_v57  ;;  %v504_v9 = vadd.f32 %v503_v2, %v502_v58  ;;  %v511_v10 = vadd.f32 %v510_v3, %v509_v59 }
  0xe5   : > { %v547_v11 = vadd.f32 %v546_v5, %v545_v60  ;;  %v554_v12 = vadd.f32 %v553_v6, %v552_v61 }
  0xe6   : > { %v465_v14 = vadd.f32 %v464_v4, %v456_v7  ;;  %v466_v15 = vadd.f32 %v464_v4, %v463_v8  ;;  %v512_v16 = vadd.f32 %v504_v9, %v464_v4  ;;  %v513_v17 = vadd.f32 %v511_v10, %v464_v4 }
  0xe7   : > { %v555_v18 = vadd.f32 %v547_v11, %v464_v4  ;;  %v556_v19 = vadd.f32 %v554_v12, %v464_v4 }
  0xe8   : > { %v516_v20 = vcombine.low %v512_v16, %v513_v17  ;;  %v469_v21 = vcombine.low %v465_v14, %v466_v15 }
  0xe9   : > { %v559_v22 = vcombine.low %v555_v18, %v556_v19 }
  0xea   : > { %v523_v23 = vrot.slane %v516_v20, %v475_v13  ;;  %v476_v24 = vrot.slane %v469_v21, %v475_v13 }
  0xeb   : > { %v566_v26 = vrot.slane %v559_v22, %v475_v13 }
  0xec   : > { %v530_v27 = vrot.slane %v523_v23, %v475_v13  ;;  %v483_v28 = vrot.slane %v476_v24, %v475_v13 }
  0xed   : > { %v573_v29 = vrot.slane %v566_v26, %v475_v13 }
  0xee   : > { %532 = vst.msk [vmem:[%s415_s24] sm:$0x3] %vm1415_vm0, %v530_v27  ;;  %489 = vst.msk [vmem:[%s408_s25] sm:$0x3] %vm1415_vm0, %v483_v28  ;;  %s1047_s24 = sshll.u32 %s1192_s17, 4  ;;  %s1048_s24 = int_to_ptr.vmem [resolvable:$false] %s1047_s24 }
  0xef   : > { %s1049_s20 = scalar_lea.vmem %s1048_s24, 64  ;;  %p1050_p4 = scmp.lt.s32.totalorder %s1427_s23, %s1048_s24 }
  0xf0   : > { %p1051_p10 = scmp.lt.s32.totalorder %s1049_s20, %s1043_s21 }
  0xf2   : > { %p1052_p13 = por %p1051_p10, %p1050_p4 }
  0xf4   : > { %p1053_p12 = pnand %p1052_p13, %p1046_p3 }
  0xf6   : > { %1056 = shalt.err (!%p1053_p12)
}
  0xf7   : > { %s1057_s1 = scalar_lea.hbm %s1422_s12, 32  ;;  %s1061_s25 = scalar_lea.hbm %s1549_s6, 64 }
  0xf8   : > { %p1058_p1 = scmp.ne.s32.totalorder %s1422_s12, %s1057_s1  ;;  %p1062_p6 = scmp.lt.s32.totalorder %s1422_s12, %s1549_s6 }
  0xf9   : > { %p1063_p7 = scmp.lt.s32.totalorder %s1061_s25, %s1057_s1 }
  0xfa   : > { %p1059_p2 = pnand %p1058_p1, %p1293_p9 }
  0xfb   : > { %p1064_p8 = por %p1063_p7, %p1062_p6 }
  0xfc   : > { %p1060_p5 = pneg %p1059_p2 }
  0xfe   : > { %p1065_p0 = pnand %p1064_p8, %p1060_p5 }
 0x100   : > { %1068 = shalt.err (!%p1065_p0)
}
 0x101   : > { %879 = dma.vmem_to_hbm [thread:$0]  (%p1293_p9), %s1427_s23, 32, %s1422_s12, %s1449_s7   ;;  %575 = vst.msk [vmem:[%s422_s29] sm:$0x3] %vm1415_vm0, %v573_v29 }
 0x102   : > { %s577_s30 = scalar_lea.sflag [#allocation5], %s1388_s19  ;;  %s1069_s21 = scalar_lea.vmem %s1434_s3, 32 }
 0x103   : > { %p1070_p3 = scmp.ne.s32.totalorder %s1434_s3, %s1069_s21  ;;  %s1193_s17 = smov [#allocation9]  }
 0x104   : > { %s1073_s24 = sshll.u32 %s1193_s17, 4  ;;  %s1074_s24 = int_to_ptr.vmem [resolvable:$false] %s1073_s24 }
 0x105   : > { %p1071_p4 = pnand %p1070_p3, %p1293_p9  ;;  %s1075_s20 = scalar_lea.vmem %s1074_s24, 64 }
 0x106   : > { %p1076_p13 = scmp.lt.s32.totalorder %s1434_s3, %s1074_s24  ;;  %p1077_p12 = scmp.lt.s32.totalorder %s1075_s20, %s1069_s21 }
 0x107   : > { %p1072_p10 = pneg %p1071_p4 }
 0x108   : > { %p1078_p1 = por %p1077_p12, %p1076_p13 }
 0x10a   : > { %p1079_p2 = pnand %p1078_p1, %p1072_p10 }
 0x10c   : > { %1082 = shalt.err (!%p1079_p2)
}
 0x10d   : > { %s1083_s16 = scalar_lea.hbm %s1432_s22, 32  ;;  %s1087_s12 = scalar_lea.hbm %s1548_s5, 64 }
 0x10e   : > { %p1084_p5 = scmp.ne.s32.totalorder %s1432_s22, %s1083_s16  ;;  %p1088_p8 = scmp.lt.s32.totalorder %s1432_s22, %s1548_s5 }
 0x10f   : > { %p1089_p0 = scmp.lt.s32.totalorder %s1087_s12, %s1083_s16 }
 0x110   : > { %p1085_p6 = pnand %p1084_p5, %p1293_p9 }
 0x111   : > { %p1090_p3 = por %p1089_p0, %p1088_p8 }
 0x112   : > { %p1086_p7 = pneg %p1085_p6 }
 0x114   : > { %p1091_p4 = pnand %p1090_p3, %p1086_p7 }
 0x116   : > { %1094 = shalt.err (!%p1091_p4)
}
 0x117   : > { %878 = dma.vmem_to_hbm [thread:$0]  (%p1293_p9), %s1434_s3, 32, %s1432_s22, %s577_s30  }
 0x118   : > { %s1095_s9 = scalar_lea.vmem %s1445_s13, 32  ;;  %s1194_s11 = smov [#allocation12]  }
 0x119   : > { %p1096_p10 = scmp.ne.s32.totalorder %s1445_s13, %s1095_s9  ;;  %s1099_s25 = sshll.u32 %s1194_s11, 4  ;;  %s1100_s25 = int_to_ptr.vmem [resolvable:$false] %s1099_s25 }
 0x11a   : > { %s1101_s10 = scalar_lea.vmem %s1100_s25, 64  ;;  %p1102_p1 = scmp.lt.s32.totalorder %s1445_s13, %s1100_s25 }
 0x11b   : > { %p1097_p13 = pnand %p1096_p10, %p1293_p9  ;;  %p1103_p2 = scmp.lt.s32.totalorder %s1101_s10, %s1095_s9 }
 0x11d   : > { %p1098_p12 = pneg %p1097_p13  ;;  %p1104_p5 = por %p1103_p2, %p1102_p1 }
 0x11f   : > { %p1105_p6 = pnand %p1104_p5, %p1098_p12 }
 0x121   : > { %1108 = shalt.err (!%p1105_p6)
}
 0x122   : > { %s1109_s18 = scalar_lea.hbm %s1443_s26, 32  ;;  %s1113_s30 = scalar_lea.hbm %s1579_s14, 64 }
 0x123   : > { %p1110_p7 = scmp.ne.s32.totalorder %s1443_s26, %s1109_s18  ;;  %p1114_p3 = scmp.lt.s32.totalorder %s1443_s26, %s1579_s14 }
 0x124   : > { %p1115_p4 = scmp.lt.s32.totalorder %s1113_s30, %s1109_s18 }
 0x125   : > { %p1111_p8 = pnand %p1110_p7, %p1293_p9 }
 0x126   : > { %p1116_p10 = por %p1115_p4, %p1114_p3 }
 0x127   : > { %p1112_p0 = pneg %p1111_p8 }
 0x129   : > { %p1117_p13 = pnand %p1116_p10, %p1112_p0 }
 0x12b   : > { %1120 = shalt.err (!%p1117_p13)
}
 0x12c   : > { %880 = dma.vmem_to_hbm [thread:$0]  (%p1293_p9), %s1445_s13, 32, %s1443_s26, %s1449_s7  }
 0x12d PF: > { %s1580_s24 = sld [smem:[#allocation17_spill]]  ;;  %p1582_p12 = scmp.ge.s32.totalorder %s1183_s8, 2 }
 0x12f   : > { %p895_p1 = pnand %p1582_p12, %p1302_p11 }
 0x131   : > { %p896_p2 = pneg %p895_p1 }
 0x133   : > { %s647_s16 = sand.u32 1, %s1580_s24  }
 0x134   : > { %s648_s19 = scalar_lea.sflag [#allocation5], %s647_s16 }
 0x135   : > { %1154 = dma.done.wait (%p896_p2), %s648_s19, 32  }
 0x136   : > { %1156 = vsyncadd (%p896_p2), %s648_s19, 4294967264  ;;  %s1583_s23 = sadd.s32 4294967294, %s1183_s8  }
 0x137   : > { %s656_s12 = sand.u32 1, %s1583_s23  }
 0x138   : > { %s657_s15 = scalar_lea.sflag [#allocation11], %s656_s12 }
 0x139   : > { %1158 = dma.done.wait (%p896_p2), %s657_s15, 64  }
 0x13a   : > { %1160 = vsyncadd (%p896_p2), %s657_s15, 4294967232  ;;  %s31_s8 = sadd.s32 1, %s1183_s8   ;;  %s1584_s13 = sld [smem:[#allocation20_spill]] }
 0x13b   : > { %p28_p9 = scmp.ge.s32.totalorder %s31_s8, 4   ;;  %s1585_s29 = sld [smem:[#allocation18_spill]] }
 0x13c   : > { %s1586_s30 = sld [smem:[#allocation19_spill]]  ;;  %s1587_s26 = smov %s1167_s27 }
 0x13d   : > { %s1588_s27 = smov %s1171_s28  ;;  %30 = sbr.rel (!%p28_p9) target bundleno = 14 (0xe), region = 141 }
 0x140   : > { %s1589_s28 = smov %s1584_s13 }
 0x142   :  { %671 = vsyncpa [#allocation4], 1 }
 0x143   :  { %673 = vsyncpa [#allocation4 + $0x1], 1 }
 0x144   :  { %674 = vsyncpa [#allocation7], 1 }
 0x145   :  { %676 = vsyncpa [#allocation7 + $0x1], 1 }
 0x146   :  { %677 = vsyncpa [#allocation5], 1 }
 0x147   :  { %679 = vsyncpa [#allocation5 + $0x1], 1 }
 0x148   :  { %680 = vsyncpa [#allocation11], 1 }
 0x149   :  { %682 = vsyncpa [#allocation11 + $0x1], 1 }

</bundles_post_ra>
